<compile_context>
chip_gen: v7x
topology: tpu7x:2x2x1
jax: 0.10.0
libtpu: 0.0.40
codegen_flags: <defaults>
</compile_context>

<pallas_src>
import jax
import jax.numpy as jnp
from jax.experimental import pallas as pl
from jax.experimental.pallas import tpu as pltpu

_LANE = 128


def _round_up(x, m):
    return ((x + m - 1) // m) * m


def _ignore_elems_mlp_kernel(x_ref, w1_ref, b1_ref, w2_ref, b2_ref, o_ref):
    # x_ref:  [TM, D]  descriptor tile (bf16 or f32), atoms on sublanes
    # w1_ref: [D, H]   layer-1 weight (same dtype as x), resident across grid
    # b1_ref: [1, H]   f32
    # w2_ref: [H, 1]   f32, layer-2 weight column
    # b2_ref: [1, 1]   f32
    # o_ref:  [TM, 1]  per-atom output column (f32)
    x = x_ref[...]
    # Layer 1 on the MXU, accumulating in f32.
    h = jnp.dot(x, w1_ref[...], preferred_element_type=jnp.float32) + b1_ref[...]
    h = jnp.tanh(h)  # EUP, f32 (valid on v5e which lacks bf16 VPU/EUP)
    # Layer 2 (H -> 1) also on the MXU: the atom axis stays on sublanes, so no
    # sublane->lane relayout is needed before the store.
    y = jnp.dot(h, w2_ref[...], preferred_element_type=jnp.float32) + b2_ref[...]
    o_ref[...] = y.astype(o_ref.dtype)


def _select_tm(n_atoms, n_desc, in_itemsize,
               vmem_budget_bytes=20 * 1024 * 1024, tm_cap=16384):
    """Pick the atom tile: as large as the VMEM budget allows (amortizing the
    ~0.35us per-grid-step overhead), accounting for lane padding of both the
    [tm, D] input tile (D padded to 128) and the [tm, 1] output column (lane
    dim padded to 128), each double-buffered."""
    d_pad = _round_up(n_desc, _LANE)
    per_atom = 2 * d_pad * in_itemsize + 2 * _LANE * 4   # input + output, x2 bufs
    max_tm = (vmem_budget_bytes // per_atom) // _LANE * _LANE
    max_tm = max(_LANE, min(max_tm, tm_cap))
    # Don't exceed the (128-rounded) atom count.
    return min(max_tm, _round_up(n_atoms, _LANE))


def _dimension_semantics(num_tiles):
    """Split the atom axis across both TensorCores on v7x; plain "parallel"
    (harmless near-no-op) on single-TC generations."""
    kind = ""
    try:
        kind = jax.devices()[0].device_kind.lower()
    except Exception:
        pass
    if num_tiles >= 2 and ("v7" in kind or "7x" in kind):
        return (pltpu.CORE_PARALLEL,)
    return ("parallel",)


def ignore_elems_forward(descriptors, elems, params, *, tm=None):
    """Pallas equivalent of IgnoreElems(subnet).forward(descriptors, elems).

    `elems` is accepted for API parity but ignored (that is the whole point
    of IgnoreElems)."""
    del elems  # ignored, matching the PyTorch module semantics
    w1, b1, w2, b2 = params
    n_atoms, n_desc = descriptors.shape
    hidden = w1.shape[1]

    # Layer-1 operands stream in the (cheap) descriptor dtype; everything
    # small / accumulation-critical stays f32.
    w1 = w1.astype(descriptors.dtype)
    b1 = jnp.asarray(b1, jnp.float32).reshape(1, hidden)
    w2_col = jnp.asarray(w2, jnp.float32).reshape(hidden, 1)
    b2 = jnp.asarray(b2, jnp.float32).reshape(1, 1)

    in_itemsize = jnp.dtype(descriptors.dtype).itemsize
    if tm is None:
        tm = _select_tm(n_atoms, n_desc, in_itemsize)
    if tm % _LANE != 0:
        raise ValueError("tm must be a multiple of 128 (lane width)")

    # Ragged last tile instead of a wrapper-side jnp.pad (which would copy the
    # whole descriptor array through HBM).  Rows are independent, so undefined
    # pad rows of a partial block never contaminate rows that are written back.
    num_tiles = pl.cdiv(n_atoms, tm)

    cost = pl.CostEstimate(
        flops=2 * n_atoms * hidden * (n_desc + 1),
        transcendentals=n_atoms * hidden,
        bytes_accessed=(n_atoms * n_desc * in_itemsize       # descriptors in
                        + n_atoms * 4                         # per-atom output
                        + n_desc * hidden * in_itemsize       # w1
                        + (2 * hidden + 1) * 4),              # b1, w2, b2
    )

    out = pl.pallas_call(
        _ignore_elems_mlp_kernel,
        out_shape=jax.ShapeDtypeStruct((n_atoms, 1), jnp.float32),
        grid_spec=pltpu.PrefetchScalarGridSpec(
            num_scalar_prefetch=0,
            grid=(num_tiles,),
            in_specs=[
                pl.BlockSpec((tm, n_desc), lambda i: (i, 0)),      # descriptor tile
                pl.BlockSpec((n_desc, hidden), lambda i: (0, 0)),  # w1 (resident)
                pl.BlockSpec((1, hidden), lambda i: (0, 0)),       # b1
                pl.BlockSpec((hidden, 1), lambda i: (0, 0)),       # w2 column
                pl.BlockSpec((1, 1), lambda i: (0, 0)),            # b2
            ],
            out_specs=pl.BlockSpec((tm, 1), lambda i: (i, 0)),     # per-atom column
        ),
        compiler_params=pltpu.CompilerParams(
            dimension_semantics=_dimension_semantics(num_tiles),
            vmem_limit_bytes=32 * 1024 * 1024,
        ),
        cost_estimate=cost,
    )(descriptors, w1, b1, w2_col, b2)
    return out


def make_params(key, n_desc, hidden, storage_dtype=jnp.bfloat16):
    """Deterministic synthetic subnet parameters (Linear -> tanh -> Linear).

    w1 is stored in `storage_dtype` (bf16 by default) to halve HBM traffic;
    biases and w2 stay f32."""
    k1, k2, k3, k4 = jax.random.split(key, 4)
    w1 = (jax.random.normal(k1, (n_desc, hidden), jnp.float32)
          * (1.0 / jnp.sqrt(n_desc))).astype(storage_dtype)
    b1 = jax.random.normal(k2, (1, hidden), jnp.float32) * 0.01
    w2 = jax.random.normal(k3, (hidden, 1), jnp.float32) * (1.0 / jnp.sqrt(hidden))
    b2 = jax.random.normal(k4, (1, 1), jnp.float32) * 0.01
    return w1, b1, w2, b2


def reference_forward(descriptors, elems, params):
    """Pure-JAX reference (elems ignored), full-precision matmuls."""
    del elems
    w1, b1, w2, b2 = params
    hi = jax.lax.Precision.HIGHEST
    x = descriptors.astype(jnp.float32)
    h = jnp.tanh(jnp.dot(x, w1.astype(jnp.float32), precision=hi)
                 + b1.astype(jnp.float32).reshape(1, -1))
    y = jnp.dot(h, w2.astype(jnp.float32).reshape(-1, 1), precision=hi)
    return y + b2.astype(jnp.float32).reshape(1, 1)


if __name__ == "__main__":
    key = jax.random.PRNGKey(0)
    k_desc, k_elems, k_params = jax.random.split(key, 3)

    n_atoms, n_desc, hidden = 300, 32, 32
    desc_f32 = jax.random.normal(k_desc, (n_atoms, n_desc), jnp.float32)
    elems = jax.random.randint(k_elems, (n_atoms,), 0, 4, jnp.int32)  # ignored

    # --- bf16 streaming path (intended production configuration) ---
    desc_bf16 = desc_f32.astype(jnp.bfloat16)
    params_bf16 = make_params(k_params, n_desc, hidden, storage_dtype=jnp.bfloat16)
    ref_bf16 = reference_forward(desc_bf16, elems, params_bf16)

    # Auto-selected tile: single (ragged) tile at this small atom count.
    out = jax.block_until_ready(ignore_elems_forward(desc_bf16, elems, params_bf16))
    assert out.shape == (n_atoms, 1)
    assert jnp.allclose(out, ref_bf16, atol=5e-3, rtol=5e-3), "mismatch (auto tile)"

    # Forced small tile: multi-tile grid with a ragged final tile (300 = 2*128 + 44).
    out_small = jax.block_until_ready(
        ignore_elems_forward(desc_bf16, elems, params_bf16, tm=128))
    assert out_small.shape == (n_atoms, 1)
    assert jnp.allclose(out_small, ref_bf16, atol=5e-3, rtol=5e-3), "mismatch (tm=128)"

    # --- f32 path (matches the PyTorch f32 subnet exactly in storage) ---
    # Loose tolerance: Mosaic / XLA may lower f32 matmuls with reduced-precision
    # MXU passes; this check is structural (ragged tiles, indexing), not bitwise.
    params_f32 = make_params(k_params, n_desc, hidden, storage_dtype=jnp.float32)
    ref_f32 = reference_forward(desc_f32, elems, params_f32)
    out_f32 = jax.block_until_ready(ignore_elems_forward(desc_f32, elems, params_f32))
    assert out_f32.shape == (n_atoms, 1)
    assert jnp.allclose(out_f32, ref_f32, atol=2e-2, rtol=2e-2), "mismatch (f32)"

    print("KERNEL_OK")
</pallas_src>

<mosaic_0001>
module attributes {stable_mosaic.version = 11 : i64} {
  func.func @_ignore_elems_mlp_kernel(%arg0: i32, %arg1: memref<384x32xbf16, #tpu.memory_space<vmem>>, %arg2: memref<32x32xbf16, #tpu.memory_space<vmem>>, %arg3: memref<1x32xf32, #tpu.memory_space<vmem>>, %arg4: memref<32x1xf32, #tpu.memory_space<vmem>>, %arg5: memref<1x1xf32, #tpu.memory_space<vmem>>, %arg6: memref<384x1xf32, #tpu.memory_space<vmem>>) attributes {dimension_semantics = [#tpu.dimension_semantics<parallel>], iteration_bounds = array<i64: 1>, scalar_prefetch = 0 : i64, scratch_operands = 0 : i64, tpu.core_type = #tpu.core_type<tc>, window_params = [{transform_indices = @transform_0, window_bounds = array<i64: 384, 32>}, {pipeline_mode = #tpu.pipeline_mode<synchronous>, transform_indices = @transform_1, window_bounds = array<i64: 32, 32>}, {pipeline_mode = #tpu.pipeline_mode<synchronous>, transform_indices = @transform_2, window_bounds = array<i64: 1, 32>}, {pipeline_mode = #tpu.pipeline_mode<synchronous>, transform_indices = @transform_3, window_bounds = array<i64: 32, 1>}, {pipeline_mode = #tpu.pipeline_mode<synchronous>, transform_indices = @transform_4, window_bounds = array<i64: 1, 1>}, {transform_indices = @transform_5, window_bounds = array<i64: 384, 1>}]} {
    %c0 = arith.constant 0 : index
    %c0_0 = arith.constant 0 : index
    %0 = vector.load %arg1[%c0, %c0_0] : memref<384x32xbf16, #tpu.memory_space<vmem>>, vector<384x32xbf16>
    %c0_1 = arith.constant 0 : index
    %c0_2 = arith.constant 0 : index
    %1 = vector.load %arg2[%c0_1, %c0_2] : memref<32x32xbf16, #tpu.memory_space<vmem>>, vector<32x32xbf16>
    %cst = arith.constant dense<0.000000e+00> : vector<384x32xf32>
    %2 = tpu.matmul %0, %1, %cst {dimension_numbers = #tpu.dot_dimension_numbers<[1], [0], [0], [1], [0, 0, 1, 1], [], []>} : vector<384x32xbf16>, vector<32x32xbf16>, vector<384x32xf32> -> vector<384x32xf32>
    %c0_3 = arith.constant 0 : index
    %c0_4 = arith.constant 0 : index
    %3 = vector.load %arg3[%c0_3, %c0_4] : memref<1x32xf32, #tpu.memory_space<vmem>>, vector<1x32xf32>
    %4 = vector.broadcast %3 : vector<1x32xf32> to vector<384x32xf32>
    %5 = arith.addf %2, %4 : vector<384x32xf32>
    %6 = math.tanh %5 : vector<384x32xf32>
    %c0_5 = arith.constant 0 : index
    %c0_6 = arith.constant 0 : index
    %7 = vector.load %arg4[%c0_5, %c0_6] : memref<32x1xf32, #tpu.memory_space<vmem>>, vector<32x1xf32>
    %cst_7 = arith.constant dense<0.000000e+00> : vector<384x1xf32>
    %8 = tpu.matmul %6, %7, %cst_7 {dimension_numbers = #tpu.dot_dimension_numbers<[1], [0], [0], [1], [0, 0, 1, 1], [], []>} : vector<384x32xf32>, vector<32x1xf32>, vector<384x1xf32> -> vector<384x1xf32>
    %c0_8 = arith.constant 0 : index
    %c0_9 = arith.constant 0 : index
    %9 = vector.load %arg5[%c0_8, %c0_9] : memref<1x1xf32, #tpu.memory_space<vmem>>, vector<1x1xf32>
    %10 = vector.broadcast %9 : vector<1x1xf32> to vector<384x1xf32>
    %11 = arith.addf %8, %10 : vector<384x1xf32>
    %c0_10 = arith.constant 0 : index
    %c0_11 = arith.constant 0 : index
    %12 = vector.load %arg6[%c0_10, %c0_11] : memref<384x1xf32, #tpu.memory_space<vmem>>, vector<384x1xf32>
    tpu.vector_store %arg6[%c0_10, %c0_11], %11 {strides = array<i32>} : memref<384x1xf32, #tpu.memory_space<vmem>>, vector<384x1xf32>,
    return
  }
  func.func @transform_0(%arg0: i32) -> (i32, i32) {
    %c0_i32 = arith.constant 0 : i32
    %c0_i32_0 = arith.constant 0 : i32
    return %arg0, %c0_i32 : i32, i32
  }
  func.func @transform_1(%arg0: i32) -> (i32, i32) {
    %c0_i32 = arith.constant 0 : i32
    %c0_i32_0 = arith.constant 0 : i32
    %c0_i32_1 = arith.constant 0 : i32
    return %c0_i32, %c0_i32_0 : i32, i32
  }
  func.func @transform_2(%arg0: i32) -> (i32, i32) {
    %c0_i32 = arith.constant 0 : i32
    %c0_i32_0 = arith.constant 0 : i32
    %c0_i32_1 = arith.constant 0 : i32
    return %c0_i32, %c0_i32_0 : i32, i32
  }
  func.func @transform_3(%arg0: i32) -> (i32, i32) {
    %c0_i32 = arith.constant 0 : i32
    %c0_i32_0 = arith.constant 0 : i32
    %c0_i32_1 = arith.constant 0 : i32
    return %c0_i32, %c0_i32_0 : i32, i32
  }
  func.func @transform_4(%arg0: i32) -> (i32, i32) {
    %c0_i32 = arith.constant 0 : i32
    %c0_i32_0 = arith.constant 0 : i32
    %c0_i32_1 = arith.constant 0 : i32
    return %c0_i32, %c0_i32_0 : i32, i32
  }
  func.func @transform_5(%arg0: i32) -> (i32, i32) {
    %c0_i32 = arith.constant 0 : i32
    %c0_i32_0 = arith.constant 0 : i32
    return %arg0, %c0_i32 : i32, i32
  }
}

</mosaic_0001>

<bundles_post_ra>
// kernel: tpu_custom_call.1
= control target key start
LH: loop header
LB: loop body
LE: loop exit
PB: predicated region body
PF: predicated region fallthrough
CT: control target
= control target key end

     0   :  { %s2137_s0 = inlined_call_operand.vmem [shape: bf16[300,32], index: 0, kind: input, shape index: {}]   ;;  %s2138_s1 = inlined_call_operand.vmem [shape: bf16[32,32], index: 1, kind: input, shape index: {}]   ;;  %s2139_s2 = inlined_call_operand.vmem [shape: f32[1,32], index: 2, kind: input, shape index: {}]   ;;  %s2140_s3 = inlined_call_operand.vmem [shape: f32[32,1], index: 3, kind: input, shape index: {}]   ;;  %s2141_s4 = inlined_call_operand.<no memory space> [shape: f32[1,1], index: 4, kind: input, shape index: {}]   ;;  %s2142_s5 = inlined_call_operand.vmem [shape: f32[300,1], index: 5, kind: output, shape index: {}]  }
   0x1   :  { %v10_v0 = vstv %s2141_s4 }
   0x2   :  { %11 = vst [vmem:[#allocation2] sm:$0x1] %v10_v0 }
   0x3   :  { %v1575_v1 = vld [vmem:[%s2138_s1] sm:$0xff]   ;;  %v1576_v2 = vld [vmem:[%s2138_s1 + $0x8] sm:$0xff]   ;;  %vm214_vm0 = vcmask 261120   ;;  %v1579_v5 = vld [vmem:[%s2137_s0 + $0x10] sm:$0xff]   ;;  %vm1020_vm1 = vcmask 7168  }
   0x4   :  { %1435 = vmatprep.subr.bf16.mxu0 %v1575_v1  ;;  %v1577_v3 = vld [vmem:[%s2137_s0] sm:$0xff]   ;;  %v1578_v4 = vld [vmem:[%s2137_s0 + $0x8] sm:$0xff]   ;;  %v1580_v6 = vld [vmem:[%s2137_s0 + $0x18] sm:$0xff]  }
   0x5   :  { %1436 = vmatpush3.bf16.msra.mxu0 %v1575_v1  ;;  %1439 = vmatprep.mubr.msk.bf16.mxu0 %vm214_vm0, %v1577_v3  ;;  %v1581_v7 = vld [vmem:[%s2137_s0 + $0x20] sm:$0xff]   ;;  %v1582_v8 = vld [vmem:[%s2137_s0 + $0x28] sm:$0xff]   ;;  %v1583_v9 = vld [vmem:[%s2137_s0 + $0x30] sm:$0xff]  }
   0x6   :  { %1437 = vmatprep.subr.bf16.mxu0 %v1576_v2  ;;  %v1584_v10 = vld [vmem:[%s2137_s0 + $0x38] sm:$0xff]   ;;  %v1585_v11 = vld [vmem:[%s2137_s0 + $0x40] sm:$0xff]   ;;  %v1586_v12 = vld [vmem:[%s2137_s0 + $0x48] sm:$0xff]  }
   0x7   :  { %v1587_v13 = vld [vmem:[%s2137_s0 + $0x50] sm:$0xff]   ;;  %v1588_v14 = vld [vmem:[%s2137_s0 + $0x58] sm:$0xff]   ;;  %v1589_v15 = vld [vmem:[%s2137_s0 + $0x60] sm:$0xff]  }
   0x8   :  { %v1590_v16 = vld [vmem:[%s2137_s0 + $0x68] sm:$0xff]   ;;  %v1591_v17 = vld [vmem:[%s2137_s0 + $0x70] sm:$0xff]   ;;  %v1592_v18 = vld [vmem:[%s2137_s0 + $0x78] sm:$0xff]  }
   0x9   :  { %1438 = vmatpush3.bf16.msra.mxu0 %v1576_v2  ;;  %v1593_v19 = vld [vmem:[%s2137_s0 + $0x80] sm:$0xff]   ;;  %v1594_v20 = vld [vmem:[%s2137_s0 + $0x88] sm:$0xff]   ;;  %v1595_v21 = vld [vmem:[%s2137_s0 + $0x90] sm:$0xff]  }
   0xa   :  { %v1596_v22 = vld [vmem:[%s2137_s0 + $0x98] sm:$0xff]   ;;  %v1597_v23 = vld [vmem:[%s2137_s0 + $0xa0] sm:$0xff]   ;;  %v1598_v24 = vld [vmem:[%s2137_s0 + $0xa8] sm:$0xff]  }
   0xb   :  { %v1599_v25 = vld [vmem:[%s2137_s0 + $0xb0] sm:$0xff]   ;;  %v1600_v26 = vld [vmem:[%s2137_s0 + $0xb8] sm:$0xff]   ;;  %v560_v27 = vld [vmem:[%s2140_s3] sm:$0xff] }
   0xc   :  { %1440 = vmatmul.mubr.msk.bf16.vlgmr.msra.gmra.mrb[0].mxu0 %vm214_vm0, %v1578_v4  ;;  %v561_v28 = vld [vmem:[%s2140_s3 + $0x8] sm:$0xff]  ;;  %v562_v30 = vld [vmem:[%s2140_s3 + $0x10] sm:$0xff]  ;;  %v563_v31 = vld [vmem:[%s2140_s3 + $0x18] sm:$0xff] }
   0xd   :  { %1443 = vmatprep.mubr.msk.bf16.mxu0 %vm214_vm0, %v1579_v5  ;;  %v1567_v29 = vpack.c.bf16 %v561_v28, %v560_v27  ;;  %v1571_v32 = vpack.c.bf16 %v563_v31, %v562_v30  ;;  %v1847_v33 = vld [vmem:[%s2139_s2] ss:$0 sm:$0xff] }
   0xf   :  { %1568 = vmatprep.subr.bf16.mxu1 %v1567_v29 }
  0x10   :  { %1570 = vmatpush3.bf16.msra.mxu1 %v1567_v29 }
  0x11   :  { %1572 = vmatprep.subr.bf16.mxu1 %v1571_v32 }
  0x14   :  { %1444 = vmatmul.mubr.msk.bf16.gmra.mrb[4].mxu0 %vm214_vm0, %v1580_v6  ;;  %1574 = vmatpush3.bf16.msra.mxu1 %v1571_v32 }
  0x15   :  { %1447 = vmatprep.mubr.msk.bf16.mxu0 %vm214_vm0, %v1581_v7 }
  0x1c   :  { %1448 = vmatmul.mubr.msk.bf16.gmra.mrb[8].mxu0 %vm214_vm0, %v1582_v8 }
  0x1d   :  { %1451 = vmatprep.mubr.msk.bf16.mxu0 %vm214_vm0, %v1583_v9 }
  0x24   :  { %1452 = vmatmul.mubr.msk.bf16.gmra.mrb[12].mxu0 %vm214_vm0, %v1584_v10 }
  0x25   :  { %1455 = vmatprep.mubr.msk.bf16.mxu0 %vm214_vm0, %v1585_v11 }
  0x2c   :  { %1456 = vmatmul.mubr.msk.bf16.gmra.mrb[16].mxu0 %vm214_vm0, %v1586_v12 }
  0x2d   :  { %1459 = vmatprep.mubr.msk.bf16.mxu0 %vm214_vm0, %v1587_v13 }
  0x34   :  { %1460 = vmatmul.mubr.msk.bf16.gmra.mrb[20].mxu0 %vm214_vm0, %v1588_v14 }
  0x35   :  { %1463 = vmatprep.mubr.msk.bf16.mxu0 %vm214_vm0, %v1589_v15 }
  0x3c   :  { %1464 = vmatmul.mubr.msk.bf16.gmra.mrb[24].mxu0 %vm214_vm0, %v1590_v16 }
  0x3d   :  { %1467 = vmatprep.mubr.msk.bf16.mxu0 %vm214_vm0, %v1591_v17 }
  0x44   :  { %1468 = vmatmul.mubr.msk.bf16.gmra.mrb[28].mxu0 %vm214_vm0, %v1592_v18 }
  0x45   :  { %1471 = vmatprep.mubr.msk.bf16.mxu0 %vm214_vm0, %v1593_v19 }
  0x4c   :  { %1472 = vmatmul.mubr.msk.bf16.gmra.mrb[32].mxu0 %vm214_vm0, %v1594_v20 }
  0x4d   :  { %1475 = vmatprep.mubr.msk.bf16.mxu0 %vm214_vm0, %v1595_v21 }
  0x54   :  { %1476 = vmatmul.mubr.msk.bf16.gmra.mrb[36].mxu0 %vm214_vm0, %v1596_v22 }
  0x55   :  { %1479 = vmatprep.mubr.msk.bf16.mxu0 %vm214_vm0, %v1597_v23 }
  0x5c   :  { %1480 = vmatmul.mubr.msk.bf16.gmra.mrb[40].mxu0 %vm214_vm0, %v1598_v24 }
  0x5d   :  { %1483 = vmatprep.mubr.msk.bf16.mxu0 %vm214_vm0, %v1599_v25 }
  0x64   :  { %1484 = vmatmul.mubr.msk.bf16.gmra.mrb[44].mxu0 %vm214_vm0, %v1600_v26 }
  0xdf   :  { %v1441_v34 = vpop.f32.mrb[0].mxu0 }
  0xe0   :  { %v321_v35 = vpop.f32.mrb[1].mxu0  ;;  %v330_v38 = vadd.f32 %v1441_v34, %v1847_v33 }
  0xe1   :  { %v322_v36 = vadd.f32 %v1847_v33, %v321_v35  ;;  %v1442_v37 = vpop.f32.mrb[2].mxu0 }
  0xe2   :  { %v324_v39 = vpop.f32.mrb[3].mxu0  ;;  %v333_v41 = vadd.f32 %v1442_v37, %v1847_v33 }
  0xe3   :  { %1601 = vtanh.f32 %v322_v36  ;;  %v325_v40 = vadd.f32 %v1847_v33, %v324_v39 }
  0xe5   :  { %1603 = vtanh.f32 %v325_v40 }
  0xe6   :  { %1605 = vtanh.f32 %v330_v38 }
  0xe7   :  { %v1445_v42 = vpop.f32.mrb[4].mxu0  ;;  %1607 = vtanh.f32 %v333_v41 }
  0xe8   :  { %v337_v43 = vpop.f32.mrb[5].mxu0  ;;  %v346_v46 = vadd.f32 %v1445_v42, %v1847_v33 }
  0xe9   :  { %v338_v44 = vadd.f32 %v1847_v33, %v337_v43  ;;  %v1446_v45 = vpop.f32.mrb[6].mxu0 }
  0xea   :  { %v340_v47 = vpop.f32.mrb[7].mxu0  ;;  %v349_v50 = vadd.f32 %v1446_v45, %v1847_v33 }
  0xeb   :  { %1609 = vtanh.f32 %v338_v44  ;;  %v341_v48 = vadd.f32 %v1847_v33, %v340_v47 }
  0xed   :  { %v1602_v49 = vpop.eup %1601  ;;  %1611 = vtanh.f32 %v341_v48 }
  0xee   :  { %1613 = vtanh.f32 %v346_v46  ;;  %1495 = vmatprep.mubr.msk.f32.mxu1 %vm214_vm0, %v1602_v49 }
  0xef   :  { %v1604_v51 = vpop.eup %1603  ;;  %v1449_v52 = vpop.f32.mrb[8].mxu0  ;;  %1615 = vtanh.f32 %v349_v50 }
  0xf0   :  { %v1606_v53 = vpop.eup %1605  ;;  %v353_v54 = vpop.f32.mrb[9].mxu0  ;;  %1496 = vmatmul.mubr.msk.f32.vlgmr.msra.gmra.mrb[0].mxu1 %vm214_vm0, %v1604_v51  ;;  %v362_v57 = vadd.f32 %v1449_v52, %v1847_v33 }
  0xf1   :  { %v354_v55 = vadd.f32 %v1847_v33, %v353_v54  ;;  %v1450_v56 = vpop.f32.mrb[10].mxu0  ;;  %1498 = vmatprep.mubr.msk.f32.mxu1 %vm214_vm0, %v1606_v53  ;;  %v1608_v59 = vpop.eup %1607 }
  0xf2   :  { %v356_v58 = vpop.f32.mrb[11].mxu0  ;;  %v365_v62 = vadd.f32 %v1450_v56, %v1847_v33 }
  0xf3   :  { %1617 = vtanh.f32 %v354_v55  ;;  %v357_v60 = vadd.f32 %v1847_v33, %v356_v58 }
  0xf4   :  { %1499 = vmatmul.mubr.msk.f32.gmra.mrb[2].mxu1 %vm214_vm0, %v1608_v59 }
  0xf5   :  { %v1610_v61 = vpop.eup %1609  ;;  %1619 = vtanh.f32 %v357_v60 }
  0xf6   :  { %1621 = vtanh.f32 %v362_v57  ;;  %1501 = vmatprep.mubr.msk.f32.mxu1 %vm214_vm0, %v1610_v61 }
  0xf7   :  { %v1612_v63 = vpop.eup %1611  ;;  %v1453_v0 = vpop.f32.mrb[12].mxu0  ;;  %1623 = vtanh.f32 %v365_v62 }
  0xf8   :  { %v1614_v1 = vpop.eup %1613  ;;  %v369_v2 = vpop.f32.mrb[13].mxu0  ;;  %1502 = vmatmul.mubr.msk.f32.gmra.mrb[4].mxu1 %vm214_vm0, %v1612_v63  ;;  %v378_v5 = vadd.f32 %v1453_v0, %v1847_v33 }
  0xf9   :  { %v370_v3 = vadd.f32 %v1847_v33, %v369_v2  ;;  %v1454_v4 = vpop.f32.mrb[14].mxu0  ;;  %1504 = vmatprep.mubr.msk.f32.mxu1 %vm214_vm0, %v1614_v1  ;;  %v1616_v7 = vpop.eup %1615 }
  0xfa   :  { %v372_v6 = vpop.f32.mrb[15].mxu0  ;;  %v381_v10 = vadd.f32 %v1454_v4, %v1847_v33 }
  0xfb   :  { %1625 = vtanh.f32 %v370_v3  ;;  %v373_v8 = vadd.f32 %v1847_v33, %v372_v6 }
  0xfc   :  { %1505 = vmatmul.mubr.msk.f32.gmra.mrb[6].mxu1 %vm214_vm0, %v1616_v7 }
  0xfd   :  { %v1618_v9 = vpop.eup %1617  ;;  %1627 = vtanh.f32 %v373_v8 }
  0xfe   :  { %1629 = vtanh.f32 %v378_v5  ;;  %1507 = vmatprep.mubr.msk.f32.mxu1 %vm214_vm0, %v1618_v9 }
  0xff   :  { %v1620_v11 = vpop.eup %1619  ;;  %v1457_v12 = vpop.f32.mrb[16].mxu0  ;;  %1631 = vtanh.f32 %v381_v10 }
 0x100   :  { %v1622_v13 = vpop.eup %1621  ;;  %v385_v14 = vpop.f32.mrb[17].mxu0  ;;  %1508 = vmatmul.mubr.msk.f32.gmra.mrb[8].mxu1 %vm214_vm0, %v1620_v11  ;;  %v394_v17 = vadd.f32 %v1457_v12, %v1847_v33 }
 0x101   :  { %v386_v15 = vadd.f32 %v1847_v33, %v385_v14  ;;  %v1458_v16 = vpop.f32.mrb[18].mxu0  ;;  %1510 = vmatprep.mubr.msk.f32.mxu1 %vm214_vm0, %v1622_v13  ;;  %v1624_v19 = vpop.eup %1623 }
 0x102   :  { %v388_v18 = vpop.f32.mrb[19].mxu0  ;;  %v397_v22 = vadd.f32 %v1458_v16, %v1847_v33 }
 0x103   :  { %1633 = vtanh.f32 %v386_v15  ;;  %v389_v20 = vadd.f32 %v1847_v33, %v388_v18 }
 0x104   :  { %1511 = vmatmul.mubr.msk.f32.gmra.mrb[10].mxu1 %vm214_vm0, %v1624_v19 }
 0x105   :  { %v1626_v21 = vpop.eup %1625  ;;  %1635 = vtanh.f32 %v389_v20 }
 0x106   :  { %1637 = vtanh.f32 %v394_v17  ;;  %1513 = vmatprep.mubr.msk.f32.mxu1 %vm214_vm0, %v1626_v21 }
 0x107   :  { %v1628_v23 = vpop.eup %1627  ;;  %v1461_v24 = vpop.f32.mrb[20].mxu0  ;;  %1639 = vtanh.f32 %v397_v22 }
 0x108   :  { %v1630_v25 = vpop.eup %1629  ;;  %v401_v26 = vpop.f32.mrb[21].mxu0  ;;  %1514 = vmatmul.mubr.msk.f32.gmra.mrb[12].mxu1 %vm214_vm0, %v1628_v23  ;;  %v410_v29 = vadd.f32 %v1461_v24, %v1847_v33 }
 0x109   :  { %v402_v27 = vadd.f32 %v1847_v33, %v401_v26  ;;  %v1462_v28 = vpop.f32.mrb[22].mxu0  ;;  %1516 = vmatprep.mubr.msk.f32.mxu1 %vm214_vm0, %v1630_v25  ;;  %v1632_v31 = vpop.eup %1631 }
 0x10a   :  { %v404_v30 = vpop.f32.mrb[23].mxu0  ;;  %v413_v35 = vadd.f32 %v1462_v28, %v1847_v33 }
 0x10b   :  { %1641 = vtanh.f32 %v402_v27  ;;  %v405_v32 = vadd.f32 %v1847_v33, %v404_v30 }
 0x10c   :  { %1517 = vmatmul.mubr.msk.f32.gmra.mrb[14].mxu1 %vm214_vm0, %v1632_v31 }
 0x10d   :  { %v1634_v34 = vpop.eup %1633  ;;  %1643 = vtanh.f32 %v405_v32 }
 0x10e   :  { %1645 = vtanh.f32 %v410_v29  ;;  %1519 = vmatprep.mubr.msk.f32.mxu1 %vm214_vm0, %v1634_v34 }
 0x10f   :  { %v1636_v36 = vpop.eup %1635  ;;  %v1465_v37 = vpop.f32.mrb[24].mxu0  ;;  %1647 = vtanh.f32 %v413_v35 }
 0x110   :  { %v1638_v38 = vpop.eup %1637  ;;  %v417_v39 = vpop.f32.mrb[25].mxu0  ;;  %1520 = vmatmul.mubr.msk.f32.gmra.mrb[16].mxu1 %vm214_vm0, %v1636_v36  ;;  %v426_v42 = vadd.f32 %v1465_v37, %v1847_v33 }
 0x111   :  { %v418_v40 = vadd.f32 %v1847_v33, %v417_v39  ;;  %v1466_v41 = vpop.f32.mrb[26].mxu0  ;;  %1522 = vmatprep.mubr.msk.f32.mxu1 %vm214_vm0, %v1638_v38  ;;  %v1640_v44 = vpop.eup %1639 }
 0x112   :  { %v420_v43 = vpop.f32.mrb[27].mxu0  ;;  %v429_v47 = vadd.f32 %v1466_v41, %v1847_v33 }
 0x113   :  { %1649 = vtanh.f32 %v418_v40  ;;  %v421_v45 = vadd.f32 %v1847_v33, %v420_v43 }
 0x114   :  { %1523 = vmatmul.mubr.msk.f32.gmra.mrb[18].mxu1 %vm214_vm0, %v1640_v44 }
 0x115   :  { %v1642_v46 = vpop.eup %1641  ;;  %1651 = vtanh.f32 %v421_v45 }
 0x116   :  { %1653 = vtanh.f32 %v426_v42  ;;  %1525 = vmatprep.mubr.msk.f32.mxu1 %vm214_vm0, %v1642_v46 }
 0x117   :  { %v1644_v48 = vpop.eup %1643  ;;  %v1469_v49 = vpop.f32.mrb[28].mxu0  ;;  %1655 = vtanh.f32 %v429_v47 }
 0x118   :  { %v1646_v50 = vpop.eup %1645  ;;  %v433_v51 = vpop.f32.mrb[29].mxu0  ;;  %1526 = vmatmul.mubr.msk.f32.gmra.mrb[20].mxu1 %vm214_vm0, %v1644_v48  ;;  %v442_v54 = vadd.f32 %v1469_v49, %v1847_v33 }
 0x119   :  { %v434_v52 = vadd.f32 %v1847_v33, %v433_v51  ;;  %v1470_v53 = vpop.f32.mrb[30].mxu0  ;;  %1528 = vmatprep.mubr.msk.f32.mxu1 %vm214_vm0, %v1646_v50  ;;  %v1648_v56 = vpop.eup %1647  ;;  %v1945_v51 = vld [vmem:[#allocation2] ss:$0 sm:$0xff] }
 0x11a   :  { %v436_v55 = vpop.f32.mrb[31].mxu0  ;;  %v445_v59 = vadd.f32 %v1470_v53, %v1847_v33 }
 0x11b   :  { %1657 = vtanh.f32 %v434_v52  ;;  %v437_v57 = vadd.f32 %v1847_v33, %v436_v55 }
 0x11c   :  { %1529 = vmatmul.mubr.msk.f32.gmra.mrb[22].mxu1 %vm214_vm0, %v1648_v56 }
 0x11d   :  { %v1650_v58 = vpop.eup %1649  ;;  %1659 = vtanh.f32 %v437_v57 }
 0x11e   :  { %1661 = vtanh.f32 %v442_v54  ;;  %1531 = vmatprep.mubr.msk.f32.mxu1 %vm214_vm0, %v1650_v58 }
 0x11f   :  { %v1652_v60 = vpop.eup %1651  ;;  %v1473_v61 = vpop.f32.mrb[32].mxu0  ;;  %1663 = vtanh.f32 %v445_v59 }
 0x120   :  { %v1654_v62 = vpop.eup %1653  ;;  %v449_v63 = vpop.f32.mrb[33].mxu0  ;;  %1532 = vmatmul.mubr.msk.f32.gmra.mrb[24].mxu1 %vm214_vm0, %v1652_v60  ;;  %v458_v2 = vadd.f32 %v1473_v61, %v1847_v33 }
 0x121   :  { %v450_v0 = vadd.f32 %v1847_v33, %v449_v63  ;;  %v1474_v1 = vpop.f32.mrb[34].mxu0  ;;  %1534 = vmatprep.mubr.msk.f32.mxu1 %vm214_vm0, %v1654_v62  ;;  %v1656_v4 = vpop.eup %1655 }
 0x122   :  { %v452_v3 = vpop.f32.mrb[35].mxu0  ;;  %v461_v7 = vadd.f32 %v1474_v1, %v1847_v33 }
 0x123   :  { %1665 = vtanh.f32 %v450_v0  ;;  %v453_v5 = vadd.f32 %v1847_v33, %v452_v3 }
 0x124   :  { %1535 = vmatmul.mubr.msk.f32.gmra.mrb[26].mxu1 %vm214_vm0, %v1656_v4 }
 0x125   :  { %v1658_v6 = vpop.eup %1657  ;;  %1667 = vtanh.f32 %v453_v5 }
 0x126   :  { %1669 = vtanh.f32 %v458_v2  ;;  %1537 = vmatprep.mubr.msk.f32.mxu1 %vm214_vm0, %v1658_v6 }
 0x127   :  { %v1660_v8 = vpop.eup %1659  ;;  %v1477_v9 = vpop.f32.mrb[36].mxu0  ;;  %1671 = vtanh.f32 %v461_v7 }
 0x128   :  { %v1662_v10 = vpop.eup %1661  ;;  %v465_v11 = vpop.f32.mrb[37].mxu0  ;;  %1538 = vmatmul.mubr.msk.f32.gmra.mrb[28].mxu1 %vm214_vm0, %v1660_v8  ;;  %v474_v14 = vadd.f32 %v1477_v9, %v1847_v33 }
 0x129   :  { %v466_v12 = vadd.f32 %v1847_v33, %v465_v11  ;;  %v1478_v13 = vpop.f32.mrb[38].mxu0  ;;  %1540 = vmatprep.mubr.msk.f32.mxu1 %vm214_vm0, %v1662_v10  ;;  %v1664_v16 = vpop.eup %1663 }
 0x12a   :  { %v468_v15 = vpop.f32.mrb[39].mxu0  ;;  %v477_v19 = vadd.f32 %v1478_v13, %v1847_v33 }
 0x12b   :  { %1673 = vtanh.f32 %v466_v12  ;;  %v469_v17 = vadd.f32 %v1847_v33, %v468_v15 }
 0x12c   :  { %1541 = vmatmul.mubr.msk.f32.gmra.mrb[30].mxu1 %vm214_vm0, %v1664_v16 }
 0x12d   :  { %v1666_v18 = vpop.eup %1665  ;;  %1675 = vtanh.f32 %v469_v17 }
 0x12e   :  { %1677 = vtanh.f32 %v474_v14  ;;  %1543 = vmatprep.mubr.msk.f32.mxu1 %vm214_vm0, %v1666_v18 }
 0x12f   :  { %v1668_v20 = vpop.eup %1667  ;;  %v1481_v21 = vpop.f32.mrb[40].mxu0  ;;  %1679 = vtanh.f32 %v477_v19 }
 0x130   :  { %v1670_v22 = vpop.eup %1669  ;;  %v481_v23 = vpop.f32.mrb[41].mxu0  ;;  %1544 = vmatmul.mubr.msk.f32.gmra.mrb[32].mxu1 %vm214_vm0, %v1668_v20  ;;  %v490_v26 = vadd.f32 %v1481_v21, %v1847_v33 }
 0x131   :  { %v482_v24 = vadd.f32 %v1847_v33, %v481_v23  ;;  %v1482_v25 = vpop.f32.mrb[42].mxu0  ;;  %1546 = vmatprep.mubr.msk.f32.mxu1 %vm214_vm0, %v1670_v22  ;;  %v1672_v28 = vpop.eup %1671 }
 0x132   :  { %v484_v27 = vpop.f32.mrb[43].mxu0  ;;  %v493_v31 = vadd.f32 %v1482_v25, %v1847_v33 }
 0x133   :  { %1681 = vtanh.f32 %v482_v24  ;;  %v485_v29 = vadd.f32 %v1847_v33, %v484_v27 }
 0x134   :  { %1547 = vmatmul.mubr.msk.f32.gmra.mrb[34].mxu1 %vm214_vm0, %v1672_v28 }
 0x135   :  { %v1674_v30 = vpop.eup %1673  ;;  %1683 = vtanh.f32 %v485_v29 }
 0x136   :  { %1685 = vtanh.f32 %v490_v26  ;;  %1549 = vmatprep.mubr.msk.f32.mxu1 %vm214_vm0, %v1674_v30 }
 0x137   :  { %v1676_v32 = vpop.eup %1675  ;;  %v1485_v34 = vpop.f32.mrb[44].mxu0  ;;  %1687 = vtanh.f32 %v493_v31 }
 0x138   :  { %v1678_v35 = vpop.eup %1677  ;;  %v497_v36 = vpop.f32.mrb[45].mxu0  ;;  %1550 = vmatmul.mubr.msk.f32.gmra.mrb[36].mxu1 %vm214_vm0, %v1676_v32  ;;  %v506_v39 = vadd.f32 %v1485_v34, %v1847_v33 }
 0x139   :  { %v498_v37 = vadd.f32 %v1847_v33, %v497_v36  ;;  %v1486_v38 = vpop.f32.mrb[46].mxu0  ;;  %1552 = vmatprep.mubr.msk.f32.mxu1 %vm214_vm0, %v1678_v35  ;;  %v1680_v41 = vpop.eup %1679 }
 0x13a   :  { %v500_v40 = vpop.f32.mrb[47].mxu0  ;;  %v509_v44 = vadd.f32 %v1486_v38, %v1847_v33 }
 0x13b   :  { %1689 = vtanh.f32 %v498_v37  ;;  %v501_v42 = vadd.f32 %v1847_v33, %v500_v40 }
 0x13c   :  { %1553 = vmatmul.mubr.msk.f32.gmra.mrb[38].mxu1 %vm214_vm0, %v1680_v41 }
 0x13d   :  { %v1682_v43 = vpop.eup %1681  ;;  %1691 = vtanh.f32 %v501_v42 }
 0x13e   :  { %1693 = vtanh.f32 %v506_v39  ;;  %1555 = vmatprep.mubr.msk.f32.mxu1 %vm214_vm0, %v1682_v43 }
 0x13f   :  { %v1684_v45 = vpop.eup %1683  ;;  %1695 = vtanh.f32 %v509_v44 }
 0x140   :  { %v1686_v46 = vpop.eup %1685  ;;  %1556 = vmatmul.mubr.msk.f32.gmra.mrb[40].mxu1 %vm214_vm0, %v1684_v45 }
 0x141   :  { %1558 = vmatprep.mubr.msk.f32.mxu1 %vm214_vm0, %v1686_v46  ;;  %v1688_v47 = vpop.eup %1687 }
 0x144   :  { %1559 = vmatmul.mubr.msk.f32.gmra.mrb[42].mxu1 %vm214_vm0, %v1688_v47 }
 0x145   :  { %v1690_v48 = vpop.eup %1689 }
 0x146   :  { %1561 = vmatprep.mubr.msk.f32.mxu1 %vm214_vm0, %v1690_v48 }
 0x147   :  { %v1692_v49 = vpop.eup %1691 }
 0x148   :  { %v1694_v50 = vpop.eup %1693  ;;  %1562 = vmatmul.mubr.msk.f32.gmra.mrb[44].mxu1 %vm214_vm0, %v1692_v49 }
 0x149   :  { %1564 = vmatprep.mubr.msk.f32.mxu1 %vm214_vm0, %v1694_v50  ;;  %v1696_v33 = vpop.eup %1695 }
 0x14c   :  { %1565 = vmatmul.mubr.msk.f32.gmra.mrb[46].mxu1 %vm214_vm0, %v1696_v33 }
 0x1c3   :  { %v1497_v52 = vpop.f32.mrb[0].mxu1 }
 0x1c4   :  { %v787_v53 = vadd.f32 %v1497_v52, %v1945_v51  ;;  %v781_v54 = vpop.f32.mrb[1].mxu1 }
 0x1c5   :  { %v782_v55 = vadd.f32 %v1945_v51, %v781_v54 }
 0x1c6   :  { %1022 = vst.msk [vmem:[#allocation3 + $0x8] sm:$0xff] %vm1020_vm1, %v787_v53 }
 0x1c7   :  { %1021 = vst.msk [vmem:[#allocation3] sm:$0xff] %vm1020_vm1, %v782_v55  ;;  %v1500_v56 = vpop.f32.mrb[2].mxu1 }
 0x1c8   :  { %v797_v57 = vadd.f32 %v1500_v56, %v1945_v51  ;;  %v791_v58 = vpop.f32.mrb[3].mxu1 }
 0x1c9   :  { %v792_v59 = vadd.f32 %v1945_v51, %v791_v58 }
 0x1ca   :  { %1024 = vst.msk [vmem:[#allocation3 + $0x18] sm:$0xff] %vm1020_vm1, %v797_v57 }
 0x1cb   :  { %1023 = vst.msk [vmem:[#allocation3 + $0x10] sm:$0xff] %vm1020_vm1, %v792_v59  ;;  %v1503_v60 = vpop.f32.mrb[4].mxu1 }
 0x1cc   :  { %v807_v61 = vadd.f32 %v1503_v60, %v1945_v51  ;;  %v801_v62 = vpop.f32.mrb[5].mxu1 }
 0x1cd   :  { %v1174_v63 = vld [vmem:[#allocation3 + $0x8] sm:$0xff]  ;;  %v802_v0 = vadd.f32 %v1945_v51, %v801_v62 }
 0x1ce   :  { %1175 = vst [vmem:[%s2142_s5 + $0x8] sm:$0xff] %v1174_v63  ;;  %v1172_v1 = vld [vmem:[#allocation3] sm:$0xff]  ;;  %1026 = vst.msk [vmem:[#allocation3 + $0x28] sm:$0xff] %vm1020_vm1, %v807_v61 }
 0x1cf   :  { %1173 = vst [vmem:[%s2142_s5] sm:$0xff] %v1172_v1  ;;  %1025 = vst.msk [vmem:[#allocation3 + $0x20] sm:$0xff] %vm1020_vm1, %v802_v0  ;;  %v1506_v2 = vpop.f32.mrb[6].mxu1 }
 0x1d0   :  { %v817_v3 = vadd.f32 %v1506_v2, %v1945_v51  ;;  %v811_v4 = vpop.f32.mrb[7].mxu1 }
 0x1d1   :  { %v1178_v5 = vld [vmem:[#allocation3 + $0x18] sm:$0xff]  ;;  %v812_v6 = vadd.f32 %v1945_v51, %v811_v4 }
 0x1d2   :  { %1179 = vst [vmem:[%s2142_s5 + $0x18] sm:$0xff] %v1178_v5  ;;  %v1176_v7 = vld [vmem:[#allocation3 + $0x10] sm:$0xff]  ;;  %1028 = vst.msk [vmem:[#allocation3 + $0x38] sm:$0xff] %vm1020_vm1, %v817_v3 }
 0x1d3   :  { %1177 = vst [vmem:[%s2142_s5 + $0x10] sm:$0xff] %v1176_v7  ;;  %1027 = vst.msk [vmem:[#allocation3 + $0x30] sm:$0xff] %vm1020_vm1, %v812_v6  ;;  %v1509_v8 = vpop.f32.mrb[8].mxu1 }
 0x1d4   :  { %v827_v9 = vadd.f32 %v1509_v8, %v1945_v51  ;;  %v821_v10 = vpop.f32.mrb[9].mxu1 }
 0x1d5   :  { %v1182_v11 = vld [vmem:[#allocation3 + $0x28] sm:$0xff]  ;;  %v822_v12 = vadd.f32 %v1945_v51, %v821_v10 }
 0x1d6   :  { %1183 = vst [vmem:[%s2142_s5 + $0x28] sm:$0xff] %v1182_v11  ;;  %v1180_v13 = vld [vmem:[#allocation3 + $0x20] sm:$0xff]  ;;  %1030 = vst.msk [vmem:[#allocation3 + $0x48] sm:$0xff] %vm1020_vm1, %v827_v9 }
 0x1d7   :  { %1181 = vst [vmem:[%s2142_s5 + $0x20] sm:$0xff] %v1180_v13  ;;  %1029 = vst.msk [vmem:[#allocation3 + $0x40] sm:$0xff] %vm1020_vm1, %v822_v12  ;;  %v1512_v14 = vpop.f32.mrb[10].mxu1 }
 0x1d8   :  { %v837_v15 = vadd.f32 %v1512_v14, %v1945_v51  ;;  %v831_v16 = vpop.f32.mrb[11].mxu1 }
 0x1d9   :  { %v1186_v17 = vld [vmem:[#allocation3 + $0x38] sm:$0xff]  ;;  %v832_v18 = vadd.f32 %v1945_v51, %v831_v16 }
 0x1da   :  { %1187 = vst [vmem:[%s2142_s5 + $0x38] sm:$0xff] %v1186_v17  ;;  %v1184_v19 = vld [vmem:[#allocation3 + $0x30] sm:$0xff]  ;;  %1032 = vst.msk [vmem:[#allocation3 + $0x58] sm:$0xff] %vm1020_vm1, %v837_v15 }
 0x1db   :  { %1185 = vst [vmem:[%s2142_s5 + $0x30] sm:$0xff] %v1184_v19  ;;  %1031 = vst.msk [vmem:[#allocation3 + $0x50] sm:$0xff] %vm1020_vm1, %v832_v18  ;;  %v1515_v20 = vpop.f32.mrb[12].mxu1 }
 0x1dc   :  { %v847_v21 = vadd.f32 %v1515_v20, %v1945_v51  ;;  %v841_v22 = vpop.f32.mrb[13].mxu1 }
 0x1dd   :  { %v1190_v23 = vld [vmem:[#allocation3 + $0x48] sm:$0xff]  ;;  %v842_v24 = vadd.f32 %v1945_v51, %v841_v22 }
 0x1de   :  { %1191 = vst [vmem:[%s2142_s5 + $0x48] sm:$0xff] %v1190_v23  ;;  %v1188_v25 = vld [vmem:[#allocation3 + $0x40] sm:$0xff]  ;;  %1034 = vst.msk [vmem:[#allocation3 + $0x68] sm:$0xff] %vm1020_vm1, %v847_v21 }
 0x1df   :  { %1189 = vst [vmem:[%s2142_s5 + $0x40] sm:$0xff] %v1188_v25  ;;  %1033 = vst.msk [vmem:[#allocation3 + $0x60] sm:$0xff] %vm1020_vm1, %v842_v24  ;;  %v1518_v26 = vpop.f32.mrb[14].mxu1 }
 0x1e0   :  { %v857_v27 = vadd.f32 %v1518_v26, %v1945_v51  ;;  %v851_v28 = vpop.f32.mrb[15].mxu1 }
 0x1e1   :  { %v1194_v29 = vld [vmem:[#allocation3 + $0x58] sm:$0xff]  ;;  %v852_v30 = vadd.f32 %v1945_v51, %v851_v28 }
 0x1e2   :  { %1195 = vst [vmem:[%s2142_s5 + $0x58] sm:$0xff] %v1194_v29  ;;  %v1192_v31 = vld [vmem:[#allocation3 + $0x50] sm:$0xff]  ;;  %1036 = vst.msk [vmem:[#allocation3 + $0x78] sm:$0xff] %vm1020_vm1, %v857_v27 }
 0x1e3   :  { %1193 = vst [vmem:[%s2142_s5 + $0x50] sm:$0xff] %v1192_v31  ;;  %1035 = vst.msk [vmem:[#allocation3 + $0x70] sm:$0xff] %vm1020_vm1, %v852_v30  ;;  %v1521_v32 = vpop.f32.mrb[16].mxu1 }
 0x1e4   :  { %v867_v34 = vadd.f32 %v1521_v32, %v1945_v51  ;;  %v861_v35 = vpop.f32.mrb[17].mxu1 }
 0x1e5   :  { %v1198_v36 = vld [vmem:[#allocation3 + $0x68] sm:$0xff]  ;;  %v862_v37 = vadd.f32 %v1945_v51, %v861_v35 }
 0x1e6   :  { %1199 = vst [vmem:[%s2142_s5 + $0x68] sm:$0xff] %v1198_v36  ;;  %v1196_v38 = vld [vmem:[#allocation3 + $0x60] sm:$0xff]  ;;  %1038 = vst.msk [vmem:[#allocation3 + $0x88] sm:$0xff] %vm1020_vm1, %v867_v34 }
 0x1e7   :  { %1197 = vst [vmem:[%s2142_s5 + $0x60] sm:$0xff] %v1196_v38  ;;  %1037 = vst.msk [vmem:[#allocation3 + $0x80] sm:$0xff] %vm1020_vm1, %v862_v37  ;;  %v1524_v39 = vpop.f32.mrb[18].mxu1 }
 0x1e8   :  { %v877_v40 = vadd.f32 %v1524_v39, %v1945_v51  ;;  %v871_v41 = vpop.f32.mrb[19].mxu1 }
 0x1e9   :  { %v1202_v42 = vld [vmem:[#allocation3 + $0x78] sm:$0xff]  ;;  %v872_v43 = vadd.f32 %v1945_v51, %v871_v41 }
 0x1ea   :  { %1203 = vst [vmem:[%s2142_s5 + $0x78] sm:$0xff] %v1202_v42  ;;  %v1200_v44 = vld [vmem:[#allocation3 + $0x70] sm:$0xff]  ;;  %1040 = vst.msk [vmem:[#allocation3 + $0x98] sm:$0xff] %vm1020_vm1, %v877_v40 }
 0x1eb   :  { %1201 = vst [vmem:[%s2142_s5 + $0x70] sm:$0xff] %v1200_v44  ;;  %1039 = vst.msk [vmem:[#allocation3 + $0x90] sm:$0xff] %vm1020_vm1, %v872_v43  ;;  %v1527_v45 = vpop.f32.mrb[20].mxu1 }
 0x1ec   :  { %v887_v46 = vadd.f32 %v1527_v45, %v1945_v51  ;;  %v881_v47 = vpop.f32.mrb[21].mxu1 }
 0x1ed   :  { %v1206_v48 = vld [vmem:[#allocation3 + $0x88] sm:$0xff]  ;;  %v882_v49 = vadd.f32 %v1945_v51, %v881_v47 }
 0x1ee   :  { %1207 = vst [vmem:[%s2142_s5 + $0x88] sm:$0xff] %v1206_v48  ;;  %v1204_v50 = vld [vmem:[#allocation3 + $0x80] sm:$0xff]  ;;  %1042 = vst.msk [vmem:[#allocation3 + $0xa8] sm:$0xff] %vm1020_vm1, %v887_v46 }
 0x1ef   :  { %1205 = vst [vmem:[%s2142_s5 + $0x80] sm:$0xff] %v1204_v50  ;;  %1041 = vst.msk [vmem:[#allocation3 + $0xa0] sm:$0xff] %vm1020_vm1, %v882_v49  ;;  %v1530_v33 = vpop.f32.mrb[22].mxu1 }
 0x1f0   :  { %v897_v52 = vadd.f32 %v1530_v33, %v1945_v51  ;;  %v891_v53 = vpop.f32.mrb[23].mxu1 }
 0x1f1   :  { %v1210_v54 = vld [vmem:[#allocation3 + $0x98] sm:$0xff]  ;;  %v892_v55 = vadd.f32 %v1945_v51, %v891_v53 }
 0x1f2   :  { %1211 = vst [vmem:[%s2142_s5 + $0x98] sm:$0xff] %v1210_v54  ;;  %v1208_v56 = vld [vmem:[#allocation3 + $0x90] sm:$0xff]  ;;  %1044 = vst.msk [vmem:[#allocation3 + $0xb8] sm:$0xff] %vm1020_vm1, %v897_v52 }
 0x1f3   :  { %1209 = vst [vmem:[%s2142_s5 + $0x90] sm:$0xff] %v1208_v56  ;;  %1043 = vst.msk [vmem:[#allocation3 + $0xb0] sm:$0xff] %vm1020_vm1, %v892_v55  ;;  %v1533_v57 = vpop.f32.mrb[24].mxu1 }
 0x1f4   :  { %v907_v58 = vadd.f32 %v1533_v57, %v1945_v51  ;;  %v901_v59 = vpop.f32.mrb[25].mxu1 }
 0x1f5   :  { %v1214_v60 = vld [vmem:[#allocation3 + $0xa8] sm:$0xff]  ;;  %v902_v61 = vadd.f32 %v1945_v51, %v901_v59 }
 0x1f6   :  { %1215 = vst [vmem:[%s2142_s5 + $0xa8] sm:$0xff] %v1214_v60  ;;  %v1212_v62 = vld [vmem:[#allocation3 + $0xa0] sm:$0xff]  ;;  %1046 = vst.msk [vmem:[#allocation3 + $0xc8] sm:$0xff] %vm1020_vm1, %v907_v58 }
 0x1f7   :  { %1213 = vst [vmem:[%s2142_s5 + $0xa0] sm:$0xff] %v1212_v62  ;;  %1045 = vst.msk [vmem:[#allocation3 + $0xc0] sm:$0xff] %vm1020_vm1, %v902_v61  ;;  %v1536_v63 = vpop.f32.mrb[26].mxu1 }
 0x1f8   :  { %v917_v0 = vadd.f32 %v1536_v63, %v1945_v51  ;;  %v911_v1 = vpop.f32.mrb[27].mxu1 }
 0x1f9   :  { %v1218_v2 = vld [vmem:[#allocation3 + $0xb8] sm:$0xff]  ;;  %v912_v3 = vadd.f32 %v1945_v51, %v911_v1 }
 0x1fa   :  { %1219 = vst [vmem:[%s2142_s5 + $0xb8] sm:$0xff] %v1218_v2  ;;  %v1216_v4 = vld [vmem:[#allocation3 + $0xb0] sm:$0xff]  ;;  %1048 = vst.msk [vmem:[#allocation3 + $0xd8] sm:$0xff] %vm1020_vm1, %v917_v0 }
 0x1fb   :  { %1217 = vst [vmem:[%s2142_s5 + $0xb0] sm:$0xff] %v1216_v4  ;;  %1047 = vst.msk [vmem:[#allocation3 + $0xd0] sm:$0xff] %vm1020_vm1, %v912_v3  ;;  %v1539_v5 = vpop.f32.mrb[28].mxu1 }
 0x1fc   :  { %v927_v6 = vadd.f32 %v1539_v5, %v1945_v51  ;;  %v921_v7 = vpop.f32.mrb[29].mxu1 }
 0x1fd   :  { %v1222_v8 = vld [vmem:[#allocation3 + $0xc8] sm:$0xff]  ;;  %v922_v9 = vadd.f32 %v1945_v51, %v921_v7 }
 0x1fe   :  { %1223 = vst [vmem:[%s2142_s5 + $0xc8] sm:$0xff] %v1222_v8  ;;  %v1220_v10 = vld [vmem:[#allocation3 + $0xc0] sm:$0xff]  ;;  %1050 = vst.msk [vmem:[#allocation3 + $0xe8] sm:$0xff] %vm1020_vm1, %v927_v6 }
 0x1ff   :  { %1221 = vst [vmem:[%s2142_s5 + $0xc0] sm:$0xff] %v1220_v10  ;;  %1049 = vst.msk [vmem:[#allocation3 + $0xe0] sm:$0xff] %vm1020_vm1, %v922_v9  ;;  %v1542_v11 = vpop.f32.mrb[30].mxu1 }
 0x200   :  { %v937_v12 = vadd.f32 %v1542_v11, %v1945_v51  ;;  %v931_v13 = vpop.f32.mrb[31].mxu1 }
 0x201   :  { %v1226_v14 = vld [vmem:[#allocation3 + $0xd8] sm:$0xff]  ;;  %v932_v15 = vadd.f32 %v1945_v51, %v931_v13 }
 0x202   :  { %1227 = vst [vmem:[%s2142_s5 + $0xd8] sm:$0xff] %v1226_v14  ;;  %v1224_v16 = vld [vmem:[#allocation3 + $0xd0] sm:$0xff]  ;;  %1052 = vst.msk [vmem:[#allocation3 + $0xf8] sm:$0xff] %vm1020_vm1, %v937_v12 }
 0x203   :  { %1225 = vst [vmem:[%s2142_s5 + $0xd0] sm:$0xff] %v1224_v16  ;;  %1051 = vst.msk [vmem:[#allocation3 + $0xf0] sm:$0xff] %vm1020_vm1, %v932_v15  ;;  %v1545_v17 = vpop.f32.mrb[32].mxu1 }
 0x204   :  { %v947_v18 = vadd.f32 %v1545_v17, %v1945_v51  ;;  %v941_v19 = vpop.f32.mrb[33].mxu1 }
 0x205   :  { %v1230_v20 = vld [vmem:[#allocation3 + $0xe8] sm:$0xff]  ;;  %v942_v21 = vadd.f32 %v1945_v51, %v941_v19 }
 0x206   :  { %1231 = vst [vmem:[%s2142_s5 + $0xe8] sm:$0xff] %v1230_v20  ;;  %v1228_v22 = vld [vmem:[#allocation3 + $0xe0] sm:$0xff]  ;;  %1054 = vst.msk [vmem:[#allocation3 + $0x108] sm:$0xff] %vm1020_vm1, %v947_v18 }
 0x207   :  { %1229 = vst [vmem:[%s2142_s5 + $0xe0] sm:$0xff] %v1228_v22  ;;  %1053 = vst.msk [vmem:[#allocation3 + $0x100] sm:$0xff] %vm1020_vm1, %v942_v21  ;;  %v1548_v23 = vpop.f32.mrb[34].mxu1 }
 0x208   :  { %v957_v24 = vadd.f32 %v1548_v23, %v1945_v51  ;;  %v951_v25 = vpop.f32.mrb[35].mxu1 }
 0x209   :  { %v1234_v26 = vld [vmem:[#allocation3 + $0xf8] sm:$0xff]  ;;  %v952_v27 = vadd.f32 %v1945_v51, %v951_v25 }
 0x20a   :  { %1235 = vst [vmem:[%s2142_s5 + $0xf8] sm:$0xff] %v1234_v26  ;;  %v1232_v28 = vld [vmem:[#allocation3 + $0xf0] sm:$0xff]  ;;  %1056 = vst.msk [vmem:[#allocation3 + $0x118] sm:$0xff] %vm1020_vm1, %v957_v24 }
 0x20b   :  { %1233 = vst [vmem:[%s2142_s5 + $0xf0] sm:$0xff] %v1232_v28  ;;  %1055 = vst.msk [vmem:[#allocation3 + $0x110] sm:$0xff] %vm1020_vm1, %v952_v27  ;;  %v1551_v29 = vpop.f32.mrb[36].mxu1 }
 0x20c   :  { %v967_v30 = vadd.f32 %v1551_v29, %v1945_v51  ;;  %v961_v31 = vpop.f32.mrb[37].mxu1 }
 0x20d   :  { %v1238_v32 = vld [vmem:[#allocation3 + $0x108] sm:$0xff]  ;;  %v962_v34 = vadd.f32 %v1945_v51, %v961_v31 }
 0x20e   :  { %1239 = vst [vmem:[%s2142_s5 + $0x108] sm:$0xff] %v1238_v32  ;;  %v1236_v35 = vld [vmem:[#allocation3 + $0x100] sm:$0xff]  ;;  %1058 = vst.msk [vmem:[#allocation3 + $0x128] sm:$0xff] %vm1020_vm1, %v967_v30 }
 0x20f   :  { %1237 = vst [vmem:[%s2142_s5 + $0x100] sm:$0xff] %v1236_v35  ;;  %1057 = vst.msk [vmem:[#allocation3 + $0x120] sm:$0xff] %vm1020_vm1, %v962_v34  ;;  %v1554_v36 = vpop.f32.mrb[38].mxu1 }
 0x210   :  { %v971_v37 = vpop.f32.mrb[39].mxu1 }
 0x211   :  { %v1242_v38 = vld [vmem:[#allocation3 + $0x118] sm:$0xff] }
 0x212   :  { %1243 = vst [vmem:[%s2142_s5 + $0x118] sm:$0xff] %v1242_v38  ;;  %v1240_v51 = vld [vmem:[#allocation3 + $0x110] sm:$0xff] }
 0x213   :  { %1241 = vst [vmem:[%s2142_s5 + $0x110] sm:$0xff] %v1240_v51  ;;  %v1557_v39 = vpop.f32.mrb[40].mxu1 }
 0x214   :  { %v981_v40 = vpop.f32.mrb[41].mxu1 }
 0x215   :  { %v1246_v41 = vld [vmem:[#allocation3 + $0x128] sm:$0xff] }
 0x216   :  { %1247 = vst [vmem:[%s2142_s5 + $0x128] sm:$0xff] %v1246_v41  ;;  %v1244_v42 = vld [vmem:[#allocation3 + $0x120] sm:$0xff] }
 0x217   :  { %1245 = vst [vmem:[%s2142_s5 + $0x120] sm:$0xff] %v1244_v42  ;;  %v1560_v43 = vpop.f32.mrb[42].mxu1 }
 0x218   :  { %v991_v44 = vpop.f32.mrb[43].mxu1 }
 0x21b   :  { %v1563_v45 = vpop.f32.mrb[44].mxu1 }
 0x21c   :  { %v1001_v46 = vpop.f32.mrb[45].mxu1 }
 0x21f   :  { %v1566_v47 = vpop.f32.mrb[46].mxu1 }
 0x220   :  { %v1011_v48 = vpop.f32.mrb[47].mxu1 }

</bundles_post_ra>
